<compile_context>
chip_gen: v5e
topology: v5e:2x2
jax: 0.10.0
libtpu: 0.0.40
codegen_flags: <defaults>
</compile_context>

<pallas_src>
import jax
import jax.numpy as jnp
from jax import lax
from jax.experimental import pallas as pl
from jax.experimental.pallas import tpu as pltpu


def _masked_mean_kernel(x_ref, len_ref, o_ref, acc_ref):
    """One (feature-tile, timestep-tile) step of the masked-mean reduction.

    x_ref:   (B, tl, td) input tile
    len_ref: (B, 1) int32 valid lengths (resident)
    o_ref:   (B, td) output (written on the last reduction step)
    acc_ref: (B, td) f32 VMEM accumulator (resident across the reduction axis)
    """
    l = pl.program_id(1)                       # reduction (timestep) axis
    nb, tl, td = x_ref.shape

    @pl.when(l == 0)
    def _init():
        acc_ref[...] = jnp.zeros_like(acc_ref)

    # Global timestep index of every element in this tile.
    t_idx = lax.broadcasted_iota(jnp.int32, (nb, tl, td), 1) + l * tl
    lens = len_ref[...]                        # (B, 1) int32
    mask = t_idx < lens[:, :, None]            # (B, tl, td) bool

    # jnp.where (not multiply) so out-of-bounds / padded tail garbage never leaks.
    xb = jnp.where(mask, x_ref[...].astype(jnp.float32), 0.0)
    acc_ref[...] += jnp.sum(xb, axis=1)        # (B, td)

    @pl.when(l == pl.num_programs(1) - 1)
    def _finalize():
        denom = jnp.maximum(lens, 1).astype(jnp.float32)   # (B, 1), avoid /0
        o_ref[...] = (acc_ref[...] / denom).astype(o_ref.dtype)


def masked_mean_pool(x, lengths=None, *, tl=None, td=None,
                     vmem_block_budget=8 * 1024 * 1024):
    """Masked mean over timesteps: (B, L, D) -> (B, D).

    lengths: optional (B,) int valid lengths; None means all L timesteps.
    tl:      timestep tile size (auto-chosen against a VMEM budget if None).
    td:      feature tile size (multiple of 128 dividing D, or the full D).
    """
    B, L, D = x.shape
    if lengths is None:
        lengths = jnp.full((B,), L, dtype=jnp.int32)
    lengths2d = lengths.astype(jnp.int32).reshape(B, 1)

    # Feature (lane) tiling: gives a "parallel" grid axis for megacore sharding
    # and bounds VMEM for very wide D. Keep the output lane-dense (mult. of 128).
    if td is None:
        td = D
        if D % 128 == 0 and D > 512:
            for cand in (512, 384, 256, 128):
                if D % cand == 0:
                    td = cand
                    break
    if td != D and (D % td != 0 or td % 128 != 0):
        td = D

    # Timestep tile: largest that keeps the double-buffered x block under budget
    # (conservative for v7x's 64 MiB physical / 32 MiB scoped VMEM).
    itembytes = jnp.dtype(x.dtype).itemsize
    if tl is None:
        max_tl = max(8, vmem_block_budget // max(1, 2 * B * td * itembytes))
        tl = L if L <= max_tl else max_tl
    tl = max(1, min(tl, L))
    if tl != L and tl % 8 != 0:
        # Block-shape rule: second-minor dim must be a multiple of 8 or == L.
        tl = max(8, (tl // 8) * 8)

    grid = (D // td, pl.cdiv(L, tl))   # ragged L tail handled by the in-kernel mask

    return pl.pallas_call(
        _masked_mean_kernel,
        out_shape=jax.ShapeDtypeStruct((B, D), x.dtype),
        grid_spec=pltpu.PrefetchScalarGridSpec(
            num_scalar_prefetch=0,
            grid=grid,
            in_specs=[
                pl.BlockSpec((B, tl, td), lambda j, l: (0, l, j)),  # x tile
                pl.BlockSpec((B, 1), lambda j, l: (0, 0)),          # lengths, resident
            ],
            out_specs=pl.BlockSpec((B, td), lambda j, l: (0, j)),   # resident per j
            scratch_shapes=[pltpu.VMEM((B, td), jnp.float32)],      # f32 accumulator
        ),
        compiler_params=pltpu.CompilerParams(
            dimension_semantics=("parallel", "arbitrary"),  # features x reduction
        ),
    )(x, lengths2d)


class TimestepsPooler:
    """JAX/Pallas port of slp.modules.fuse.BaseTimestepsPooler.

    Keeps the torch forward() dispatch exactly: 2-D inputs pass through,
    3-D inputs are pooled over timesteps, anything else raises.
    """
    # TODO(synk): BaseTimestepsPooler._pool is abstract in torch; this port
    # supplies masked-mean pooling as the concrete _pool implementation.

    def __init__(self, feature_size, batch_first=True):
        self.pooling_dim = 0 if not batch_first else 1
        self.batch_first = batch_first
        self.feature_size = feature_size

    @property
    def out_size(self):
        return self.feature_size

    def _pool(self, x, lengths=None):
        return masked_mean_pool(x, lengths)

    def __call__(self, x, lengths=None):
        if x.ndim == 2:
            return x
        if x.ndim != 3:
            raise ValueError("Expected 3 dimensional tensor [B, L, D] or [L, B, D]")
        if not self.batch_first:
            # TODO(synk): time-major inputs are transposed with XLA before the
            # kernel (batch-first is the documented default for this module).
            x = jnp.swapaxes(x, 0, 1)  # [L, B, D] -> [B, L, D]
        return self._pool(x, lengths=lengths)


if __name__ == "__main__":
    key = jax.random.PRNGKey(0)
    B, L, D = 4, 16, 256          # [batch, seq, hidden]; D lane-dense (2x128)
    k1, k2, k3, k4 = jax.random.split(key, 4)

    x = jax.random.normal(k1, (B, L, D), jnp.float32)
    lengths = jnp.array([16, 9, 1, 5], dtype=jnp.int32)

    pooler = TimestepsPooler(feature_size=D, batch_first=True)

    ok = True

    # 1) masked mean with explicit lengths
    y = jax.block_until_ready(pooler(x, lengths=lengths))
    m = (jnp.arange(L)[None, :] < lengths[:, None]).astype(jnp.float32)
    ref = (x * m[:, :, None]).sum(axis=1) / jnp.maximum(lengths, 1)[:, None].astype(jnp.float32)
    ok = ok and (y.shape == (B, D)) and bool(jnp.allclose(y, ref, atol=1e-5, rtol=1e-5))

    # 2) no lengths -> plain mean over all timesteps
    y2 = jax.block_until_ready(pooler(x))
    ok = ok and bool(jnp.allclose(y2, x.mean(axis=1), atol=1e-5, rtol=1e-5))

    # 3) longer sequence forcing a multi-step reduction grid (tl=64, 3 steps)
    L2 = 192
    x2 = jax.random.normal(k2, (B, L2, D), jnp.float32)
    lengths2 = jnp.array([192, 131, 64, 7], dtype=jnp.int32)
    y3 = jax.block_until_ready(masked_mean_pool(x2, lengths2, tl=64))
    m2 = (jnp.arange(L2)[None, :] < lengths2[:, None]).astype(jnp.float32)
    ref3 = (x2 * m2[:, :, None]).sum(axis=1) / jnp.maximum(lengths2, 1)[:, None].astype(jnp.float32)
    ok = ok and bool(jnp.allclose(y3, ref3, atol=1e-5, rtol=1e-5))

    # 4) exercise the 2-D grid (parallel feature tiles x reduction tiles)
    y4 = jax.block_until_ready(masked_mean_pool(x2, lengths2, tl=64, td=128))
    ok = ok and bool(jnp.allclose(y4, ref3, atol=1e-5, rtol=1e-5))

    # 5) 2-D passthrough semantics of the base forward()
    x2d = jax.random.normal(k3, (B, D), jnp.float32)
    ok = ok and bool(jnp.array_equal(pooler(x2d), x2d))

    # 6) batch_first=False path ([L, B, D] input)
    pooler_tm = TimestepsPooler(feature_size=D, batch_first=False)
    x_tm = jax.random.normal(k4, (L, B, D), jnp.float32)
    y6 = jax.block_until_ready(pooler_tm(x_tm, lengths=lengths))
    ref6 = (jnp.swapaxes(x_tm, 0, 1) * m[:, :, None]).sum(axis=1) / \
        jnp.maximum(lengths, 1)[:, None].astype(jnp.float32)
    ok = ok and bool(jnp.allclose(y6, ref6, atol=1e-5, rtol=1e-5))

    print("KERNEL_OK" if ok else "KERNEL_MISMATCH")
</pallas_src>

<mosaic_0001>
module attributes {stable_mosaic.version = 11 : i64} {
  func.func @_masked_mean_kernel(%arg0: i32, %arg1: i32, %arg2: memref<4x16x256xf32, #tpu.memory_space<vmem>>, %arg3: memref<4x1xi32, #tpu.memory_space<vmem>>, %arg4: memref<4x256xf32, #tpu.memory_space<vmem>>, %arg5: memref<4x256xf32, #tpu.memory_space<vmem>>) attributes {dimension_semantics = [#tpu.dimension_semantics<parallel>, #tpu.dimension_semantics<arbitrary>], iteration_bounds = array<i64: 1, 1>, scalar_prefetch = 0 : i64, scratch_operands = 1 : i64, tpu.core_type = #tpu.core_type<tc>, window_params = [{transform_indices = @transform_0, window_bounds = array<i64: 4, 16, 256>}, {pipeline_mode = #tpu.pipeline_mode<synchronous>, transform_indices = @transform_1, window_bounds = array<i64: 4, 1>}, {transform_indices = @transform_2, window_bounds = array<i64: 4, 256>}]} {
    %c0_i32 = arith.constant 0 : i32
    %0 = arith.cmpi eq, %arg1, %c0_i32 : i32
    %1 = arith.extui %0 : i1 to i32
    %c0_i32_0 = arith.constant 0 : i32
    %2 = arith.cmpi ne, %1, %c0_i32_0 : i32
    scf.if %2 {
      %cst_12 = arith.constant 0.000000e+00 : f32
      %21 = vector.broadcast %cst_12 : f32 to vector<4x256xf32>
      %c0_13 = arith.constant 0 : index
      %c0_14 = arith.constant 0 : index
      %22 = vector.load %arg5[%c0_13, %c0_14] : memref<4x256xf32, #tpu.memory_space<vmem>>, vector<4x256xf32>
      tpu.vector_store %arg5[%c0_13, %c0_14], %21 {strides = array<i32>} : memref<4x256xf32, #tpu.memory_space<vmem>>, vector<4x256xf32>,
    } else {
    }
    %3 = tpu.iota {dimensions = array<i32: 1>} : vector<4x16x256xi32>
    %c16_i32 = arith.constant 16 : i32
    %4 = arith.muli %arg1, %c16_i32 : i32
    %5 = vector.broadcast %4 : i32 to vector<4x16x256xi32>
    %6 = arith.addi %3, %5 : vector<4x16x256xi32>
    %c0 = arith.constant 0 : index
    %c0_1 = arith.constant 0 : index
    %7 = vector.load %arg3[%c0, %c0_1] : memref<4x1xi32, #tpu.memory_space<vmem>>, vector<4x1xi32>
    %8 = vector.shape_cast %7 : vector<4x1xi32> to vector<4x1x1xi32>
    %9 = vector.broadcast %8 : vector<4x1x1xi32> to vector<4x16x256xi32>
    %10 = arith.cmpi slt, %6, %9 : vector<4x16x256xi32>
    %c0_2 = arith.constant 0 : index
    %c0_3 = arith.constant 0 : index
    %c0_4 = arith.constant 0 : index
    %11 = vector.load %arg2[%c0_2, %c0_3, %c0_4] : memref<4x16x256xf32, #tpu.memory_space<vmem>>, vector<4x16x256xf32>
    %cst = arith.constant 0.000000e+00 : f32
    %12 = vector.broadcast %cst : f32 to vector<4x16x256xf32>
    %13 = arith.select %10, %11, %12 : vector<4x16x256xi1>, vector<4x16x256xf32>
    %c0_5 = arith.constant 0 : index
    %c0_6 = arith.constant 0 : index
    %14 = vector.load %arg5[%c0_5, %c0_6] : memref<4x256xf32, #tpu.memory_space<vmem>>, vector<4x256xf32>
    %cst_7 = arith.constant dense<0.000000e+00> : vector<4x256xf32>
    %15 = vector.multi_reduction <add>, %13, %cst_7 [1] : vector<4x16x256xf32> to vector<4x256xf32>
    %16 = arith.addf %14, %15 : vector<4x256xf32>
    %c0_8 = arith.constant 0 : index
    %c0_9 = arith.constant 0 : index
    %17 = vector.load %arg5[%c0_8, %c0_9] : memref<4x256xf32, #tpu.memory_space<vmem>>, vector<4x256xf32>
    tpu.vector_store %arg5[%c0_8, %c0_9], %16 {strides = array<i32>} : memref<4x256xf32, #tpu.memory_space<vmem>>, vector<4x256xf32>,
    %c0_i32_10 = arith.constant 0 : i32
    %18 = arith.cmpi eq, %arg1, %c0_i32_10 : i32
    %19 = arith.extui %18 : i1 to i32
    %c0_i32_11 = arith.constant 0 : i32
    %20 = arith.cmpi ne, %19, %c0_i32_11 : i32
    scf.if %20 {
      %c1_i32 = arith.constant 1 : i32
      %21 = vector.broadcast %c1_i32 : i32 to vector<4x1xi32>
      %22 = arith.maxsi %7, %21 : vector<4x1xi32>
      %23 = arith.sitofp %22 : vector<4x1xi32> to vector<4x1xf32>
      %c0_12 = arith.constant 0 : index
      %c0_13 = arith.constant 0 : index
      %24 = vector.load %arg5[%c0_12, %c0_13] : memref<4x256xf32, #tpu.memory_space<vmem>>, vector<4x256xf32>
      %25 = vector.broadcast %23 : vector<4x1xf32> to vector<4x256xf32>
      %26 = arith.divf %24, %25 : vector<4x256xf32>
      %c0_14 = arith.constant 0 : index
      %c0_15 = arith.constant 0 : index
      %27 = vector.load %arg4[%c0_14, %c0_15] : memref<4x256xf32, #tpu.memory_space<vmem>>, vector<4x256xf32>
      tpu.vector_store %arg4[%c0_14, %c0_15], %26 {strides = array<i32>} : memref<4x256xf32, #tpu.memory_space<vmem>>, vector<4x256xf32>,
    } else {
    }
    return
  }
  func.func @transform_0(%arg0: i32, %arg1: i32) -> (i32, i32, i32) {
    %c0_i32 = arith.constant 0 : i32
    %c0_i32_0 = arith.constant 0 : i32
    return %c0_i32, %arg1, %arg0 : i32, i32, i32
  }
  func.func @transform_1(%arg0: i32, %arg1: i32) -> (i32, i32) {
    %c0_i32 = arith.constant 0 : i32
    %c0_i32_0 = arith.constant 0 : i32
    %c0_i32_1 = arith.constant 0 : i32
    return %c0_i32, %c0_i32_0 : i32, i32
  }
  func.func @transform_2(%arg0: i32, %arg1: i32) -> (i32, i32) {
    %c0_i32 = arith.constant 0 : i32
    %c0_i32_0 = arith.constant 0 : i32
    return %c0_i32, %arg0 : i32, i32
  }
}

</mosaic_0001>

<bundles_post_ra>
// kernel: tpu_custom_call.1
= control target key start
LH: loop header
LB: loop body
LE: loop exit
PB: predicated region body
PF: predicated region fallthrough
CT: control target
= control target key end

     0   :  { %7 = vsyncpa [#allocation4], 0  ;;  %s376_s0 = inlined_call_operand.hbm [shape: f32[4,16,256], index: 0, kind: input, shape index: {}]   ;;  %s377_s1 = inlined_call_operand.vmem [shape: s32[4,1], index: 1, kind: input, shape index: {}]   ;;  %s378_s2 = inlined_call_operand.hbm [shape: f32[4,256], index: 2, kind: output, shape index: {}]  }
   0x1   :  { %8 = vsyncpa [#allocation5], 0  ;;  %s13_s11 = sshll.u32 %s376_s0, 4  ;;  %s304_s12 = smov [#allocation3]   ;;  %s14_s11 = int_to_ptr.hbm [resolvable:$true] %s13_s11 }
   0x2   :  { %s15_s13 = sshll.u32 %s304_s12, 4  ;;  %s305_s14 = smov 256   ;;  %s16_s13 = int_to_ptr.vmem [resolvable:$true] %s15_s13 }
   0x3   :  { %s306_s15 = smov 16  }
   0x4   :  { %21 = dma.hbm_to_vmem [thread:$0]  %s14_s11, 2048, %s16_s13, [#allocation4], %s305_s14, %s305_s14, %s306_s15  }
   0x5   :  { %300 = dma.done.wait [#allocation4], 2048  }
   0x6   :  { %301 = vsyncadd [#allocation4], 4294965248  ;;  %v307_v0 = vmov 0   ;;  %v40_v1 = vld [vmem:[%s377_s1] sm:$0xf]  ;;  %v33_v11 = vlaneseq  ;;  %v77_v17 = vld [vmem:[#allocation3 + $0x48] sm:$0xff] }
   0x7   :  { %248 = vset.pattern.permute.xlu1 %v307_v0  ;;  %247 = vset.pattern.permute.xlu0 %v307_v0  ;;  %v42_v2 = vrot.slane %v40_v1, 2  ;;  %v41_v3 = vrot.slane %v40_v1, 1  ;;  %vm195_vm0 = vcmp.gt.s32.totalorder %v40_v1, 1  ;;  %v43_v8 = vrot.slane %v40_v1, 3  ;;  %v76_v16 = vld [vmem:[#allocation3 + $0x40] sm:$0xff]  ;;  %v78_v18 = vld [vmem:[#allocation3 + $0x50] sm:$0xff] }
   0x8   :  { %249 = vset.pattern.permute.xlu2 %v307_v0  ;;  %v196_v6 = vsel %vm195_vm0, %v40_v1, 1  ;;  %v44_v10 = vperm.slane %v40_v1, 0  ;;  %v331_v12 = vshrl.u32 %v33_v11, 7  ;;  %v308_v13 = vmov 839922192   ;;  %v79_v19 = vld [vmem:[#allocation3 + $0x58] sm:$0xff] }
   0x9   :  { %v46_v4 = vperm.slane %v42_v2, 0  ;;  %v45_v5 = vperm.slane %v41_v3, 0  ;;  %v197_v7 = vcvt.s32.f32 %v196_v6  ;;  %v47_v9 = vperm.slane %v43_v8, 0  ;;  %v72_v21 = vld [vmem:[#allocation3 + $0x20] sm:$0xff]  ;;  %v73_v22 = vld [vmem:[#allocation3 + $0x28] sm:$0xff]  ;;  %v74_v25 = vld [vmem:[#allocation3 + $0x30] sm:$0xff] }
   0xa   :  { %v204_v14 = vunpack.c.l.s4 %v308_v13  ;;  %v334_v15 = vadd.s32 8, %v331_v12  ;;  %v75_v26 = vld [vmem:[#allocation3 + $0x38] sm:$0xff]  ;;  %v80_v45 = vld [vmem:[#allocation3 + $0x60] sm:$0xff]  ;;  %v81_v50 = vld [vmem:[#allocation3 + $0x68] sm:$0xff]  ;;  %vm169_vm9 = vcmask 1043456   ;;  %vm175_vm10 = vcmask 1041409  }
   0xb   :  { %55 = vperm.xlu1 %248, %v46_v4   ;;  %52 = vperm.xlu0 %247, %v45_v5   ;;  %v82_v51 = vld [vmem:[#allocation3 + $0x70] sm:$0xff]  ;;  %v83_v52 = vld [vmem:[#allocation3 + $0x78] sm:$0xff]  ;;  %v68_v56 = vld [vmem:[#allocation3] sm:$0xff]  ;;  %vm177_vm13 = vcmask 1045509   ;;  %vm180_vm14 = vcmask 1042434   ;;  %vm182_vm0 = vcmask 1046534  }
   0xc   :  { %201 = vperm.xlu2 %249, %v197_v7   ;;  %v205_v24 = vunpack.c.0.s8 %v204_v14  ;;  %v69_v61 = vld [vmem:[#allocation3 + $0x8] sm:$0xff]  ;;  %v70_v63 = vld [vmem:[#allocation3 + $0x10] sm:$0xff]  ;;  %v71_v0 = vld [vmem:[#allocation3 + $0x18] sm:$0xff]  ;;  %s309_s0 = smov [#allocation6]   ;;  %s231_s20 = sshll.u32 %s378_s2, 4  ;;  %s232_s20 = int_to_ptr.hbm [resolvable:$true] %s231_s20 }
   0xd   :  { %s229_s1 = sshll.u32 %s309_s0, 4  ;;  %s230_s1 = int_to_ptr.vmem [resolvable:$true] %s229_s1 }
  0x13   :  { %58 = vperm.xlu1 %248, %v47_v9   ;;  %49 = vperm.xlu0 %247, %v44_v10  }
  0x66   :  { %v202_v34 = vpop.permute.xlu2 %201 }
  0x67   :  { %v340_v41 = vperm.slane %v202_v34, %v205_v24 }
  0x69   :  { %250 = vrcp.f32 %v340_v41  ;;  %vm213_vm11 = vweird.f32 %v340_v41 }
  0x6f   :  { %v351_v8 = vpop.eup %250 }
  0x70   :  { %vm214_vm12 = vweird.f32 %v351_v8 }
  0x71   :  { %vm365_vm15 = vmor %vm213_vm11, %vm214_vm12 }
  0x7d   :  { %v56_v20 = vpop.permute.xlu1 %55  ;;  %v53_v23 = vpop.permute.xlu0 %52 }
  0x7e   :  { %vm64_vm1 = vcmp.lt.s32.totalorder %v331_v12, %v56_v20  ;;  %vm65_vm2 = vcmp.lt.s32.totalorder %v334_v15, %v56_v20  ;;  %vm62_vm3 = vcmp.lt.s32.totalorder %v331_v12, %v53_v23  ;;  %vm63_vm4 = vcmp.lt.s32.totalorder %v334_v15, %v53_v23 }
  0x7f   :  { %v92_v27 = vsel %vm64_vm1, %v76_v16, 0.0  ;;  %v93_v28 = vsel %vm64_vm1, %v77_v17, 0.0  ;;  %v94_v29 = vsel %vm65_vm2, %v78_v18, 0.0  ;;  %v95_v30 = vsel %vm65_vm2, %v79_v19, 0.0 }
  0x80   :  { %v136_v31 = vadd.f32 %v95_v30, %v93_v28  ;;  %v88_v32 = vsel %vm62_vm3, %v72_v21, 0.0  ;;  %v89_v33 = vsel %vm62_vm3, %v73_v22, 0.0  ;;  %v90_v35 = vsel %vm63_vm4, %v74_v25, 0.0 }
  0x81   :  { %v91_v36 = vsel %vm63_vm4, %v75_v26, 0.0  ;;  %v129_v37 = vadd.f32 %v94_v29, %v92_v27  ;;  %v115_v39 = vadd.f32 %v90_v35, %v88_v32  ;;  %vm185_vm1 = vcmask 1043459  }
  0x82   :  { %v137_v38 = vrot.slane %v136_v31, 4  ;;  %v122_v40 = vadd.f32 %v91_v36, %v89_v33  ;;  %vm187_vm3 = vcmask 1047559  }
  0x83   :  { %v116_v43 = vrot.slane %v115_v39, 4  ;;  %v130_v48 = vrot.slane %v129_v37, 4 }
  0x84   :  { %v138_v42 = vadd.f32 %v137_v38, %v136_v31  ;;  %v123_v44 = vrot.slane %v122_v40, 4 }
  0x85   :  { %v59_v46 = vpop.permute.xlu1 %58  ;;  %v50_v47 = vpop.permute.xlu0 %49  ;;  %v117_v54 = vadd.f32 %v116_v43, %v115_v39  ;;  %v131_v62 = vadd.f32 %v130_v48, %v129_v37 }
  0x86   :  { %v124_v49 = vadd.f32 %v123_v44, %v122_v40  ;;  %vm66_vm5 = vcmp.lt.s32.totalorder %v331_v12, %v59_v46  ;;  %vm67_vm6 = vcmp.lt.s32.totalorder %v334_v15, %v59_v46  ;;  %v139_v53 = vrot.slane %v138_v42, 2 }
  0x87   :  { %vm60_vm7 = vcmp.lt.s32.totalorder %v331_v12, %v50_v47  ;;  %v96_v57 = vsel %vm66_vm5, %v80_v45, 0.0  ;;  %v97_v58 = vsel %vm66_vm5, %v81_v50, 0.0  ;;  %v98_v59 = vsel %vm67_vm6, %v82_v51, 0.0 }
  0x88   :  { %v125_v55 = vrot.slane %v124_v49, 2  ;;  %v99_v60 = vsel %vm67_vm6, %v83_v52, 0.0  ;;  %vm61_vm8 = vcmp.lt.s32.totalorder %v334_v15, %v50_v47  ;;  %v143_v2 = vadd.f32 %v98_v59, %v96_v57 }
  0x89   :  { %v150_v3 = vadd.f32 %v99_v60, %v97_v58  ;;  %v84_v4 = vsel %vm60_vm7, %v68_v56, 0.0  ;;  %v140_v5 = vadd.f32 %v139_v53, %v138_v42  ;;  %v118_v6 = vrot.slane %v117_v54, 2 }
  0x8a   :  { %v126_v1 = vadd.f32 %v125_v55, %v124_v49  ;;  %v85_v7 = vsel %vm60_vm7, %v69_v61, 0.0  ;;  %v144_v9 = vrot.slane %v143_v2, 4  ;;  %v86_v11 = vsel %vm61_vm8, %v70_v63, 0.0 }
  0x8b   :  { %v151_v10 = vrot.slane %v150_v3, 4  ;;  %v87_v13 = vsel %vm61_vm8, %v71_v0, 0.0  ;;  %v132_v14 = vrot.slane %v131_v62, 2  ;;  %v101_v16 = vadd.f32 %v86_v11, %v84_v4 }
  0x8c   :  { %v127_v15 = vrot.slane %v126_v1, 1  ;;  %v145_v17 = vadd.f32 %v144_v9, %v143_v2  ;;  %v108_v19 = vadd.f32 %v87_v13, %v85_v7  ;;  %v141_v20 = vrot.slane %v140_v5, 1 }
  0x8d   :  { %v152_v18 = vadd.f32 %v151_v10, %v150_v3  ;;  %v102_v21 = vrot.slane %v101_v16, 4  ;;  %v119_v22 = vadd.f32 %v118_v6, %v117_v54  ;;  %v209_v12 = vmul.f32 %v351_v8, %v340_v41 }
  0x8e   :  { %v146_v23 = vrot.slane %v145_v17, 2  ;;  %v109_v25 = vrot.slane %v108_v19, 4  ;;  %v133_v27 = vadd.f32 %v132_v14, %v131_v62  ;;  %v128_v28 = vadd.f32 %v127_v15, %v126_v1 }
  0x8f   :  { %v153_v24 = vrot.slane %v152_v18, 2  ;;  %v103_v26 = vadd.f32 %v102_v21, %v101_v16  ;;  %v142_v31 = vadd.f32 %v141_v20, %v140_v5  ;;  %v120_v33 = vrot.slane %v119_v22, 1 }
  0x90   :  { %v110_v30 = vadd.f32 %v109_v25, %v108_v19  ;;  %v147_v34 = vadd.f32 %v146_v23, %v145_v17  ;;  %v210_v37 = vsub.f32 1.0, %v209_v12  ;;  %v134_v39 = vrot.slane %v133_v27, 1 }
  0x91   :  { %v154_v29 = vadd.f32 %v153_v24, %v152_v18  ;;  %v104_v32 = vrot.slane %v103_v26, 2  ;;  %v166_v40 = vrot.slane %v128_v28, 4  ;;  %v167_v44 = vrot.slane %v142_v31, 4 }
  0x92   :  { %v111_v36 = vrot.slane %v110_v30, 2  ;;  %v121_v45 = vadd.f32 %v120_v33, %v119_v22  ;;  %v148_v46 = vrot.slane %v147_v34, 1  ;;  %v211_v49 = vmul.f32 %v351_v8, %v210_v37 }
  0x93   :  { %v155_v35 = vrot.slane %v154_v29, 1  ;;  %v105_v38 = vadd.f32 %v104_v32, %v103_v26  ;;  %v219_v50 = vand.u32 2147483648, %v340_v41  ;;  %v135_v51 = vadd.f32 %v134_v39, %v133_v27 }
  0x94   :  { %v112_v43 = vadd.f32 %v111_v36, %v110_v30  ;;  %v171_v52 = vsel %vm169_vm9, %v121_v45, %v166_v40  ;;  %v217_v55 = vand.u32 2147483647, %v340_v41  ;;  %v149_v57 = vadd.f32 %v148_v46, %v147_v34 }
  0x95   :  { %v156_v42 = vadd.f32 %v155_v35, %v154_v29  ;;  %v106_v47 = vrot.slane %v105_v38, 1  ;;  %v172_v56 = vsel %vm169_vm9, %v135_v51, %v167_v44  ;;  %v174_v60 = vrot.slane %v171_v52, 7 }
  0x96   :  { %v113_v48 = vrot.slane %v112_v43, 1  ;;  %v212_v61 = vadd.f32 %v351_v8, %v211_v49  ;;  %v179_v1 = vrot.slane %v172_v56, 6  ;;  %vm218_vm2 = vcmp.eq.f32.partialorder %v217_v55, 8.507059e+37 }
  0x97   :  { %v168_v53 = vrot.slane %v156_v42, 4  ;;  %v107_v58 = vadd.f32 %v106_v47, %v105_v38  ;;  %v220_v3 = vor.u32 1.1754944e-38, %v219_v50 }
  0x98   :  { %v114_v54 = vadd.f32 %v113_v48, %v112_v43  ;;  %v216_v6 = vsel %vm365_vm15, %v351_v8, %v212_v61 }
  0x99   :  { %v173_v63 = vsel %vm169_vm9, %v149_v57, %v168_v53  ;;  %v221_v11 = vsel %vm218_vm2, %v220_v3, %v216_v6 }
  0x9a   :  { %v165_v59 = vrot.slane %v114_v54, 4  ;;  %v184_v5 = vrot.slane %v173_v63, 5 }
  0x9c   :  { %v170_v62 = vsel %vm169_vm9, %v107_v58, %v165_v59 }
  0x9d   :  { %v176_v41 = vsel %vm175_vm10, %v174_v60, %v170_v62 }
  0x9e   :  { %v178_v2 = vsel %vm177_vm13, %v174_v60, %v176_v41 }
  0x9f   :  { %v181_v4 = vsel %vm180_vm14, %v179_v1, %v178_v2 }
  0xa0   :  { %v183_v7 = vsel %vm182_vm0, %v179_v1, %v181_v4 }
  0xa1   :  { %v186_v9 = vsel %vm185_vm1, %v184_v5, %v183_v7 }
  0xa2   :  { %v188_v10 = vsel %vm187_vm3, %v184_v5, %v186_v9 }
  0xa3   :  { %v222_v13 = vmul.f32 %v221_v11, %v188_v10 }
  0xa5   :  { %223 = vst [vmem:[#allocation6] sm:$0xff] %v222_v13 }
  0xa6   :  { %234 = dma.vmem_to_hbm [thread:$0]  %s230_s1, 128, %s232_s20, [#allocation5]  }
  0xa7   :  { %302 = dma.done.wait [#allocation5], 128  }
  0xa8   :  { %303 = vsyncadd [#allocation5], 4294967168 }
  0xa9   :  { %239 = vsyncpa [#allocation4], 1 }
  0xaa   :  { %240 = vsyncpa [#allocation5], 1 }

</bundles_post_ra>
